<compile_context>
chip_gen: v7x
topology: tpu7x:2x2x1
jax: 0.10.0
libtpu: 0.0.40
codegen_flags: <defaults>
</compile_context>

<pallas_src>
import functools

import jax
import jax.numpy as jnp
from jax import lax
from jax.experimental import pallas as pl
from jax.experimental.pallas import tpu as pltpu


def _cdiv(a, b):
    return (a + b - 1) // b


def _dice_sums_kernel(score_ref, target_ref, out_ref, *, apply_softmax,
                      num_chunks, tile, hw, tiles_per_core, need_mask, unroll):
    # score_ref:  (C, TILE)            native dtype scores for one pixel tile
    # target_ref: (TILE//128, 128)     int32 labels, sublane-dense
    # out_ref:    (3, C, 128) float32  lane-wide resident accumulator
    #                                  [intersect; y_sum; z_sum] partials.
    c_dim = score_ref.shape[0]

    @pl.when((pl.program_id(1) == 0) & (pl.program_id(2) == 0))
    def _init():
        out_ref[...] = jnp.zeros_like(out_ref)

    # Hoisted constants (one vreg each, reused by every chunk).
    cls = lax.broadcasted_iota(jnp.int32, (c_dim, 128), 0)
    if need_mask:
        lane = lax.broadcasted_iota(jnp.int32, (1, 128), 1)
        global_tile = pl.program_id(0) * tiles_per_core + pl.program_id(2)
        valid_in_tile = hw - global_tile * tile        # may be <=0 or > tile

    zeros = jnp.zeros((c_dim, 128), jnp.float32)

    def body(g, carry):
        acc_i, acc_y, acc_z = carry
        lo = pl.multiple_of(g * 128, 128)
        s = score_ref[:, pl.ds(lo, 128)].astype(jnp.float32)   # (C, 128)
        t = target_ref[pl.ds(g, 1), :]                         # (1, 128) int32
        if need_mask:
            m = lane < (valid_in_tile - g * 128)               # (1, 128) bool
            s = jnp.where(m, s, 0.0)      # also guards against garbage inf/nan
            t = jnp.where(m, t, -1)       # -1 never matches a class id
        if apply_softmax:
            mx = jnp.max(s, axis=0, keepdims=True)
            e = jnp.exp(s - mx)
            d = jnp.sum(e, axis=0, keepdims=True)
            r = pl.reciprocal(d, approx=True)
            r = r * (2.0 - d * r)         # one Newton step -> ~full f32 accuracy
            s = e * r
            if need_mask:
                s = s * m.astype(jnp.float32)
        one_hot = (t == cls).astype(jnp.float32)               # fused one-hot
        return (acc_i + s * one_hot, acc_y + one_hot, acc_z + s * s)

    acc_i, acc_y, acc_z = lax.fori_loop(0, num_chunks, body,
                                        (zeros, zeros, zeros), unroll=unroll)

    out_ref[0, :, :] += acc_i
    out_ref[1, :, :] += acc_y
    out_ref[2, :, :] += acc_z


def _vmem_capacity_bytes():
    try:
        info = pltpu.get_tpu_info()
        cap = getattr(info, "vmem_capacity_bytes", None)
        if cap:
            return int(cap)
    except Exception:
        pass
    return 128 * 1024 * 1024


def dice_loss(inputs, target, n_classes, weight=None, softmax=False, tile=None):
    """Matches DiceLoss.forward(inputs, target, weight, softmax).

    inputs: (N, C, H, W) scores (f32 or bf16); target: (N, H, W) int labels.
    """
    inputs = jnp.asarray(inputs)
    target = jnp.asarray(target)
    N, C, H, W = inputs.shape
    assert C == n_classes, "channel dim must equal n_classes"
    HW = H * W
    hw128 = _cdiv(HW, 128)

    # Scores: natural layout, native dtype (no upcast, no pad -> no extra HBM copy).
    if inputs.dtype not in (jnp.float32, jnp.bfloat16):
        inputs = inputs.astype(jnp.float32)
    score = inputs.reshape(N, C, HW)

    # Labels: sublane-dense (N, HW/128, 128) int32 (tiny pad only if HW % 128 != 0).
    labels = target.reshape(N, HW)
    if labels.dtype != jnp.int32:
        labels = labels.astype(jnp.int32)
    if hw128 * 128 != HW:
        labels = jnp.pad(labels, ((0, 0), (0, hw128 * 128 - HW)),
                         constant_values=-1)
    labels = labels.reshape(N, hw128, 128)

    # ---- generation-aware tile / VMEM budget ----
    itemsize = score.dtype.itemsize
    sub = {4: 8, 2: 16, 1: 32}[itemsize]
    c_rows = _cdiv(C, sub) * sub                  # VMEM sublane rounding
    score_bpl = c_rows * itemsize                 # score bytes per pixel-lane
    lab_bpl = 4                                   # dense int32 labels

    vmem_cap = _vmem_capacity_bytes()
    if vmem_cap >= 96 * 1024 * 1024:              # v5e / v6e (128 MiB VMEM)
        budget, default_tile, limit_cap = 56 << 20, 65536, 100 << 20
    else:                                         # v7x (64 MiB VMEM)
        budget, default_tile, limit_cap = 20 << 20, 32768, 40 << 20

    target_tile = int(tile) if tile is not None else default_tile
    tile_cap = budget // (2 * (score_bpl + lab_bpl))          # double-buffered
    tile_max = max(1024, (min(target_tile, tile_cap) // 1024) * 1024)

    hw_lanes = hw128 * 128
    if hw_lanes <= tile_max:
        tile = hw_lanes        # one tile per image; label block dim == array dim
    else:
        tile = tile_max        # multiple of 1024 -> label block sublanes legal
    num_chunks = tile // 128
    num_tiles = _cdiv(HW, tile)

    # 2-way pixel-tile split across TensorCores (no-op-ish on single-TC chips).
    # TODO(synk): query the real TensorCore-per-chip count instead of a heuristic.
    n_split = 2 if num_tiles >= 2 else 1
    tiles_per_core = _cdiv(num_tiles, n_split)
    need_mask = (HW % tile != 0) or (n_split * tiles_per_core != num_tiles)

    if n_split * tiles_per_core == num_tiles:
        def gmap(c, p):
            return c * tiles_per_core + p
    else:
        def gmap(c, p):       # clamp so DMAs never target a fully-OOB block
            return jnp.minimum(c * tiles_per_core + p, num_tiles - 1)

    kernel = functools.partial(
        _dice_sums_kernel, apply_softmax=bool(softmax), num_chunks=num_chunks,
        tile=tile, hw=HW, tiles_per_core=tiles_per_core, need_mask=need_mask,
        unroll=min(4, num_chunks))

    score_buf = c_rows * itemsize * tile
    lab_buf = max(num_chunks, 8) * 128 * 4
    out_buf = 3 * _cdiv(C, 8) * 8 * 128 * 4
    vmem_limit = int(min(limit_cap,
                         max(16 << 20,
                             2 * (score_buf + lab_buf + out_buf) + (4 << 20))))

    sums = pl.pallas_call(
        kernel,
        out_shape=jax.ShapeDtypeStruct((n_split, 3, C, 128), jnp.float32),
        grid_spec=pltpu.PrefetchScalarGridSpec(
            num_scalar_prefetch=0,
            grid=(n_split, N, tiles_per_core),
            in_specs=[
                pl.BlockSpec((None, C, tile),
                             lambda c, n, p: (n, 0, gmap(c, p))),
                pl.BlockSpec((None, num_chunks, 128),
                             lambda c, n, p: (n, gmap(c, p), 0)),
            ],
            out_specs=pl.BlockSpec((None, 3, C, 128),
                                   lambda c, n, p: (c, 0, 0, 0)),
        ),
        compiler_params=pltpu.CompilerParams(
            dimension_semantics=("parallel", "arbitrary", "arbitrary"),
            vmem_limit_bytes=vmem_limit,
        ),
    )(score, labels)

    # Epilogue: reduce the core-split axis and the 128 lanes once, in glue.
    sums = jnp.sum(sums, axis=(0, 3))             # (3, C)
    intersect, y_sum, z_sum = sums[0], sums[1], sums[2]

    smooth = 1e-5
    dice = 1.0 - (2.0 * intersect + smooth) / (z_sum + y_sum + smooth)

    if weight is None:
        weight = jnp.ones((C,), jnp.float32)
    else:
        weight = jnp.asarray(weight, jnp.float32)
    return jnp.sum(dice * weight) / n_classes


class DiceLoss:
    """Thin functional stand-in for the PyTorch module."""

    def __init__(self, n_classes):
        self.n_classes = n_classes

    def __call__(self, inputs, target, weight=None, softmax=False):
        return dice_loss(inputs, target, self.n_classes, weight, softmax)


def _reference_dice_loss(inputs, target, n_classes, weight=None, softmax=False):
    # Pure-JAX reference mirroring the PyTorch module.
    inputs = inputs.astype(jnp.float32)
    if softmax:
        inputs = jax.nn.softmax(inputs, axis=1)
    one_hot = (target[:, None, :, :]
               == jnp.arange(n_classes)[None, :, None, None]).astype(jnp.float32)
    if weight is None:
        weight = [1.0] * n_classes
    smooth = 1e-5
    loss = 0.0
    for i in range(n_classes):
        s = inputs[:, i]
        t = one_hot[:, i]
        intersect = jnp.sum(s * t)
        y_sum = jnp.sum(t * t)
        z_sum = jnp.sum(s * s)
        dice = 1.0 - (2.0 * intersect + smooth) / (z_sum + y_sum + smooth)
        loss = loss + dice * weight[i]
    return loss / n_classes


if __name__ == "__main__":
    key = jax.random.PRNGKey(0)

    # Case 1: typical use (softmax=True), C=4, 16x16 -> single tile, no masking.
    N, C, H, W = 2, 4, 16, 16
    k1, k2 = jax.random.split(key)
    inputs = jax.random.normal(k1, (N, C, H, W), dtype=jnp.float32)
    target = jax.random.randint(k2, (N, H, W), 0, C, dtype=jnp.int32)
    loss = jax.block_until_ready(dice_loss(inputs, target, n_classes=C, softmax=True))
    ref = _reference_dice_loss(inputs, target, n_classes=C, softmax=True)
    assert jnp.allclose(loss, ref, rtol=1e-4, atol=1e-5), (loss, ref)

    # Case 2: odd shapes — C=3 (non-multiple-of-8 block), 15x15=225 pixels
    # (ragged 128-lane tail masked in-kernel), with class weights.
    N2, C2, H2, W2 = 2, 3, 15, 15
    k3, k4 = jax.random.split(k1)
    inputs2 = jax.random.normal(k3, (N2, C2, H2, W2), dtype=jnp.float32)
    target2 = jax.random.randint(k4, (N2, H2, W2), 0, C2, dtype=jnp.int32)
    w = [0.2, 0.5, 0.3]
    loss2 = jax.block_until_ready(
        dice_loss(inputs2, target2, n_classes=C2, weight=w, softmax=True))
    ref2 = _reference_dice_loss(inputs2, target2, n_classes=C2, weight=w, softmax=True)
    assert jnp.allclose(loss2, ref2, rtol=1e-4, atol=1e-5), (loss2, ref2)

    # Case 3: softmax=False path (already-activated scores).
    probs = jax.nn.sigmoid(inputs)
    loss3 = jax.block_until_ready(dice_loss(probs, target, n_classes=C, softmax=False))
    ref3 = _reference_dice_loss(probs, target, n_classes=C, softmax=False)
    assert jnp.allclose(loss3, ref3, rtol=1e-4, atol=1e-5), (loss3, ref3)

    # Case 4: multi-tile path with a forced small tile (1024 lanes): 48x48=2304
    # pixels -> 3 tiles, 2-way core split, one partially valid tile and one
    # fully out-of-range (clamped + masked) tile.
    N4, C4, H4, W4 = 2, 4, 48, 48
    k5, k6 = jax.random.split(k3)
    inputs4 = jax.random.normal(k5, (N4, C4, H4, W4), dtype=jnp.float32)
    target4 = jax.random.randint(k6, (N4, H4, W4), 0, C4, dtype=jnp.int32)
    loss4 = jax.block_until_ready(
        dice_loss(inputs4, target4, n_classes=C4, softmax=True, tile=1024))
    ref4 = _reference_dice_loss(inputs4, target4, n_classes=C4, softmax=True)
    assert jnp.allclose(loss4, ref4, rtol=1e-4, atol=1e-5), (loss4, ref4)

    # Case 5: bf16 scores streamed straight into the kernel (cast in VMEM).
    inputs5 = inputs4.astype(jnp.bfloat16)
    loss5 = jax.block_until_ready(
        dice_loss(inputs5, target4, n_classes=C4, softmax=True, tile=1024))
    ref5 = _reference_dice_loss(inputs5, target4, n_classes=C4, softmax=True)
    assert jnp.allclose(loss5, ref5, rtol=1e-3, atol=1e-4), (loss5, ref5)

    print("KERNEL_OK")
</pallas_src>

<mosaic_0001>
module attributes {stable_mosaic.version = 11 : i64} {
  func.func @_dice_sums_kernel(%arg0: i32, %arg1: i32, %arg2: i32, %arg3: memref<1x4x256xf32, #tpu.memory_space<vmem>>, %arg4: memref<1x2x128xi32, #tpu.memory_space<vmem>>, %arg5: memref<1x3x4x128xf32, #tpu.memory_space<vmem>>) attributes {dimension_semantics = [#tpu.dimension_semantics<parallel>, #tpu.dimension_semantics<arbitrary>, #tpu.dimension_semantics<arbitrary>], iteration_bounds = array<i64: 1, 2, 1>, scalar_prefetch = 0 : i64, scratch_operands = 0 : i64, tpu.core_type = #tpu.core_type<tc>, window_params = [{transform_indices = @transform_0, window_bounds = array<i64: 1, 4, 256>}, {transform_indices = @transform_1, window_bounds = array<i64: 1, 2, 128>}, {transform_indices = @transform_2, window_bounds = array<i64: 1, 3, 4, 128>}]} {
    %c0_i32 = arith.constant 0 : i32
    %0 = arith.cmpi eq, %arg1, %c0_i32 : i32
    %c0_i32_0 = arith.constant 0 : i32
    %1 = arith.cmpi eq, %arg2, %c0_i32_0 : i32
    %2 = arith.andi %0, %1 : i1
    %3 = arith.extui %2 : i1 to i32
    %c0_i32_1 = arith.constant 0 : i32
    %4 = arith.cmpi ne, %3, %c0_i32_1 : i32
    scf.if %4 {
      %cst_39 = arith.constant 0.000000e+00 : f32
      %87 = vector.broadcast %cst_39 : f32 to vector<3x4x128xf32>
      %c0_40 = arith.constant 0 : index
      %c0_41 = arith.constant 0 : index
      %c0_42 = arith.constant 0 : index
      %c0_43 = arith.constant 0 : index
      %88 = vector.load %arg5[%c0_40, %c0_41, %c0_42, %c0_43] : memref<1x3x4x128xf32, #tpu.memory_space<vmem>>, vector<1x3x4x128xf32>
      %89 = vector.shape_cast %88 : vector<1x3x4x128xf32> to vector<3x4x128xf32>
      %90 = vector.shape_cast %87 : vector<3x4x128xf32> to vector<1x3x4x128xf32>
      tpu.vector_store %arg5[%c0_40, %c0_41, %c0_42, %c0_43], %90 {strides = array<i32>} : memref<1x3x4x128xf32, #tpu.memory_space<vmem>>, vector<1x3x4x128xf32>,
    } else {
    }
    %5 = tpu.iota {dimensions = array<i32: 0>} : vector<4x128xi32>
    %cst = arith.constant 0.000000e+00 : f32
    %6 = vector.broadcast %cst : f32 to vector<4x128xf32>
    %c0_i32_2 = arith.constant 0 : i32
    %c128_i32 = arith.constant 128 : i32
    %7 = arith.muli %c0_i32_2, %c128_i32 : i32
    %8 = tpu.assume_multiple %7, 128 : i32
    %c0 = arith.constant 0 : index
    %c0_3 = arith.constant 0 : index
    %9 = arith.index_cast %8 : i32 to index
    %10 = vector.load %arg3[%c0, %c0_3, %9] : memref<1x4x256xf32, #tpu.memory_space<vmem>>, vector<1x4x128xf32>
    %11 = vector.shape_cast %10 : vector<1x4x128xf32> to vector<4x128xf32>
    %c0_4 = arith.constant 0 : index
    %12 = arith.index_cast %c0_i32_2 : i32 to index
    %c0_5 = arith.constant 0 : index
    %13 = vector.load %arg4[%c0_4, %12, %c0_5] : memref<1x2x128xi32, #tpu.memory_space<vmem>>, vector<1x1x128xi32>
    %14 = vector.shape_cast %13 : vector<1x1x128xi32> to vector<1x128xi32>
    %cst_6 = arith.constant dense<0xFF800000> : vector<128xf32>
    %15 = vector.multi_reduction <maximumf>, %11, %cst_6 [0] : vector<4x128xf32> to vector<128xf32>
    %16 = vector.shape_cast %15 : vector<128xf32> to vector<1x128xf32>
    %17 = vector.broadcast %16 : vector<1x128xf32> to vector<4x128xf32>
    %18 = arith.subf %11, %17 : vector<4x128xf32>
    %19 = math.exp %18 : vector<4x128xf32>
    %cst_7 = arith.constant dense<0.000000e+00> : vector<128xf32>
    %20 = vector.multi_reduction <add>, %19, %cst_7 [0] : vector<4x128xf32> to vector<128xf32>
    %21 = vector.shape_cast %20 : vector<128xf32> to vector<1x128xf32>
    %22 = tpu.reciprocal %21 {approx = true} : vector<1x128xf32> -> vector<1x128xf32>
    %23 = arith.mulf %21, %22 : vector<1x128xf32>
    %cst_8 = arith.constant 2.000000e+00 : f32
    %24 = vector.broadcast %cst_8 : f32 to vector<1x128xf32>
    %25 = arith.subf %24, %23 : vector<1x128xf32>
    %26 = arith.mulf %22, %25 : vector<1x128xf32>
    %27 = vector.broadcast %26 : vector<1x128xf32> to vector<4x128xf32>
    %28 = arith.mulf %19, %27 : vector<4x128xf32>
    %29 = vector.broadcast %14 : vector<1x128xi32> to vector<4x128xi32>
    %30 = arith.cmpi eq, %29, %5 : vector<4x128xi32>
    %31 = arith.extui %30 : vector<4x128xi1> to vector<4x128xi32>
    %32 = arith.sitofp %31 : vector<4x128xi32> to vector<4x128xf32>
    %33 = arith.mulf %28, %32 : vector<4x128xf32>
    %34 = arith.addf %6, %33 : vector<4x128xf32>
    %35 = arith.addf %6, %32 : vector<4x128xf32>
    %36 = arith.mulf %28, %28 : vector<4x128xf32>
    %37 = arith.addf %6, %36 : vector<4x128xf32>
    %c1_i32 = arith.constant 1 : i32
    %c128_i32_9 = arith.constant 128 : i32
    %38 = arith.muli %c1_i32, %c128_i32_9 : i32
    %39 = tpu.assume_multiple %38, 128 : i32
    %c0_10 = arith.constant 0 : index
    %c0_11 = arith.constant 0 : index
    %40 = arith.index_cast %39 : i32 to index
    %41 = vector.load %arg3[%c0_10, %c0_11, %40] : memref<1x4x256xf32, #tpu.memory_space<vmem>>, vector<1x4x128xf32>
    %42 = vector.shape_cast %41 : vector<1x4x128xf32> to vector<4x128xf32>
    %c0_12 = arith.constant 0 : index
    %43 = arith.index_cast %c1_i32 : i32 to index
    %c0_13 = arith.constant 0 : index
    %44 = vector.load %arg4[%c0_12, %43, %c0_13] : memref<1x2x128xi32, #tpu.memory_space<vmem>>, vector<1x1x128xi32>
    %45 = vector.shape_cast %44 : vector<1x1x128xi32> to vector<1x128xi32>
    %cst_14 = arith.constant dense<0xFF800000> : vector<128xf32>
    %46 = vector.multi_reduction <maximumf>, %42, %cst_14 [0] : vector<4x128xf32> to vector<128xf32>
    %47 = vector.shape_cast %46 : vector<128xf32> to vector<1x128xf32>
    %48 = vector.broadcast %47 : vector<1x128xf32> to vector<4x128xf32>
    %49 = arith.subf %42, %48 : vector<4x128xf32>
    %50 = math.exp %49 : vector<4x128xf32>
    %cst_15 = arith.constant dense<0.000000e+00> : vector<128xf32>
    %51 = vector.multi_reduction <add>, %50, %cst_15 [0] : vector<4x128xf32> to vector<128xf32>
    %52 = vector.shape_cast %51 : vector<128xf32> to vector<1x128xf32>
    %53 = tpu.reciprocal %52 {approx = true} : vector<1x128xf32> -> vector<1x128xf32>
    %54 = arith.mulf %52, %53 : vector<1x128xf32>
    %cst_16 = arith.constant 2.000000e+00 : f32
    %55 = vector.broadcast %cst_16 : f32 to vector<1x128xf32>
    %56 = arith.subf %55, %54 : vector<1x128xf32>
    %57 = arith.mulf %53, %56 : vector<1x128xf32>
    %58 = vector.broadcast %57 : vector<1x128xf32> to vector<4x128xf32>
    %59 = arith.mulf %50, %58 : vector<4x128xf32>
    %60 = vector.broadcast %45 : vector<1x128xi32> to vector<4x128xi32>
    %61 = arith.cmpi eq, %60, %5 : vector<4x128xi32>
    %62 = arith.extui %61 : vector<4x128xi1> to vector<4x128xi32>
    %63 = arith.sitofp %62 : vector<4x128xi32> to vector<4x128xf32>
    %64 = arith.mulf %59, %63 : vector<4x128xf32>
    %65 = arith.addf %34, %64 : vector<4x128xf32>
    %66 = arith.addf %35, %63 : vector<4x128xf32>
    %67 = arith.mulf %59, %59 : vector<4x128xf32>
    %68 = arith.addf %37, %67 : vector<4x128xf32>
    %c2_i32 = arith.constant 2 : i32
    %c0_17 = arith.constant 0 : index
    %c0_18 = arith.constant 0 : index
    %c0_19 = arith.constant 0 : index
    %c0_20 = arith.constant 0 : index
    %69 = vector.load %arg5[%c0_17, %c0_18, %c0_19, %c0_20] : memref<1x3x4x128xf32, #tpu.memory_space<vmem>>, vector<1x1x4x128xf32>
    %70 = vector.shape_cast %69 : vector<1x1x4x128xf32> to vector<4x128xf32>
    %71 = arith.addf %70, %65 : vector<4x128xf32>
    %c0_21 = arith.constant 0 : index
    %c0_22 = arith.constant 0 : index
    %c0_23 = arith.constant 0 : index
    %c0_24 = arith.constant 0 : index
    %72 = vector.load %arg5[%c0_21, %c0_22, %c0_23, %c0_24] : memref<1x3x4x128xf32, #tpu.memory_space<vmem>>, vector<1x1x4x128xf32>
    %73 = vector.shape_cast %72 : vector<1x1x4x128xf32> to vector<4x128xf32>
    %74 = vector.shape_cast %71 : vector<4x128xf32> to vector<1x1x4x128xf32>
    tpu.vector_store %arg5[%c0_21, %c0_22, %c0_23, %c0_24], %74 {strides = array<i32>} : memref<1x3x4x128xf32, #tpu.memory_space<vmem>>, vector<1x1x4x128xf32>,
    %c0_25 = arith.constant 0 : index
    %c1 = arith.constant 1 : index
    %c0_26 = arith.constant 0 : index
    %c0_27 = arith.constant 0 : index
    %75 = vector.load %arg5[%c0_25, %c1, %c0_26, %c0_27] : memref<1x3x4x128xf32, #tpu.memory_space<vmem>>, vector<1x1x4x128xf32>
    %76 = vector.shape_cast %75 : vector<1x1x4x128xf32> to vector<4x128xf32>
    %77 = arith.addf %76, %66 : vector<4x128xf32>
    %c0_28 = arith.constant 0 : index
    %c1_29 = arith.constant 1 : index
    %c0_30 = arith.constant 0 : index
    %c0_31 = arith.constant 0 : index
    %78 = vector.load %arg5[%c0_28, %c1_29, %c0_30, %c0_31] : memref<1x3x4x128xf32, #tpu.memory_space<vmem>>, vector<1x1x4x128xf32>
    %79 = vector.shape_cast %78 : vector<1x1x4x128xf32> to vector<4x128xf32>
    %80 = vector.shape_cast %77 : vector<4x128xf32> to vector<1x1x4x128xf32>
    tpu.vector_store %arg5[%c0_28, %c1_29, %c0_30, %c0_31], %80 {strides = array<i32>} : memref<1x3x4x128xf32, #tpu.memory_space<vmem>>, vector<1x1x4x128xf32>,
    %c0_32 = arith.constant 0 : index
    %c2 = arith.constant 2 : index
    %c0_33 = arith.constant 0 : index
    %c0_34 = arith.constant 0 : index
    %81 = vector.load %arg5[%c0_32, %c2, %c0_33, %c0_34] : memref<1x3x4x128xf32, #tpu.memory_space<vmem>>, vector<1x1x4x128xf32>
    %82 = vector.shape_cast %81 : vector<1x1x4x128xf32> to vector<4x128xf32>
    %83 = arith.addf %82, %68 : vector<4x128xf32>
    %c0_35 = arith.constant 0 : index
    %c2_36 = arith.constant 2 : index
    %c0_37 = arith.constant 0 : index
    %c0_38 = arith.constant 0 : index
    %84 = vector.load %arg5[%c0_35, %c2_36, %c0_37, %c0_38] : memref<1x3x4x128xf32, #tpu.memory_space<vmem>>, vector<1x1x4x128xf32>
    %85 = vector.shape_cast %84 : vector<1x1x4x128xf32> to vector<4x128xf32>
    %86 = vector.shape_cast %83 : vector<4x128xf32> to vector<1x1x4x128xf32>
    tpu.vector_store %arg5[%c0_35, %c2_36, %c0_37, %c0_38], %86 {strides = array<i32>} : memref<1x3x4x128xf32, #tpu.memory_space<vmem>>, vector<1x1x4x128xf32>,
    return
  }
  func.func @transform_0(%arg0: i32, %arg1: i32, %arg2: i32) -> (i32, i32, i32) {
    %c1_i32 = arith.constant 1 : i32
    %0 = arith.muli %arg0, %c1_i32 : i32
    %1 = arith.addi %0, %arg2 : i32
    %c0_i32 = arith.constant 0 : i32
    %c0_i32_0 = arith.constant 0 : i32
    return %arg1, %c0_i32, %1 : i32, i32, i32
  }
  func.func @transform_1(%arg0: i32, %arg1: i32, %arg2: i32) -> (i32, i32, i32) {
    %c1_i32 = arith.constant 1 : i32
    %0 = arith.muli %arg0, %c1_i32 : i32
    %1 = arith.addi %0, %arg2 : i32
    %c0_i32 = arith.constant 0 : i32
    %c0_i32_0 = arith.constant 0 : i32
    return %arg1, %1, %c0_i32 : i32, i32, i32
  }
  func.func @transform_2(%arg0: i32, %arg1: i32, %arg2: i32) -> (i32, i32, i32, i32) {
    %c0_i32 = arith.constant 0 : i32
    %c0_i32_0 = arith.constant 0 : i32
    %c0_i32_1 = arith.constant 0 : i32
    %c0_i32_2 = arith.constant 0 : i32
    return %arg0, %c0_i32, %c0_i32_0, %c0_i32_1 : i32, i32, i32, i32
  }
}

</mosaic_0001>

<bundles_post_ra>
// kernel: tpu_custom_call.1
= control target key start
LH: loop header
LB: loop body
LE: loop exit
PB: predicated region body
PF: predicated region fallthrough
CT: control target
= control target key end

     0   :  { %7 = vsyncpa [#allocation3], 0  ;;  %s892_s0 = inlined_call_operand.hbm [shape: f32[2,4,256], index: 0, kind: input, shape index: {}]   ;;  %s893_s1 = inlined_call_operand.hbm [shape: s32[2,2,128], index: 1, kind: input, shape index: {}]   ;;  %s894_s2 = inlined_call_operand.hbm [shape: f32[1,3,4,128], index: 2, kind: output, shape index: {}]  }
   0x1   :  { %9 = vsyncpa [#allocation3 + $0x1], 0 }
   0x2   :  { %10 = vsyncpa [#allocation6], 0 }
   0x3   :  { %12 = vsyncpa [#allocation6 + $0x1], 0 }
   0x4   :  { %13 = vsyncpa [#allocation4], 0  ;;  %s696_s9 = smov 0   ;;  %s698_s10 = smov 0  }
   0x5   :  { %s700_s11 = smov 0   ;;  %s702_s12 = smov 0  }
   0x6   :  { %s704_s13 = smov 0   ;;  %s706_s14 = smov 0  }
   0x7 LB: > { %s426_s15 = sadd.s32 4294967295, %s672_s14   ;;  %s34_s16 = sadd.s32 1, %s668_s13  ;;  %s672_s14 = sphi %s706_s14, %s19_s14   ;;  %s668_s13 = sphi %s704_s13, %s909_s13   ;;  %s664_s12 = sphi %s702_s12, %s908_s12   ;;  %s660_s11 = sphi %s700_s11, %s907_s11   ;;  %s656_s10 = sphi %s698_s10, %s906_s10   ;;  %s652_s9 = sphi %s696_s9, %s905_s9  }
   0x8   : > { %p36_p0 = scmp.ge.s32.totalorder %s34_s16, 2  ;;  %s49_s17 = sadd.s32 1, %s660_s11 }
   0x9   : > { %p56_p1 = scmp.ne.s32.totalorder %s660_s11, %s656_s10  ;;  %p57_p2 = scmp.eq.s32.totalorder %s672_s14, 0 }
   0xa   : > { %s911_s16 = smov (%p36_p0, %s34_s16), 0  ;;  %p62_p4 = scmp.ne.s32.totalorder %s656_s10, %s652_s9 }
   0xb   : > { %p732_p3 = por %p57_p2, %p56_p1  ;;  %s44_s19 = ssub.s32 %s668_s13, %s911_s16 }
   0xc   : > { %p63_p5 = scmp.eq.s32.totalorder %s426_s15, 0  ;;  %p47_p6 = scmp.eq.s32.totalorder %s44_s19, 0 }
   0xd   : > { %p464_p8 = scmp.lt.s32.totalorder %s672_s14, 2  ;;  %s750_s22 = sand.u32 1, %s660_s11  }
   0xe   : > { %p741_p7 = por %p63_p5, %p62_p4  ;;  %s447_s23 = sshll.u32 %s668_s13, 7 }
   0xf   : > { %s747_s21 = scalar_select %p47_p6, %s660_s11, %s49_s17  }
  0x10   : > { %s897_s20 = scalar_select %p741_p7, 1, 0 }
  0x11   : > { %s429_s24 = sshll.u32 %s750_s22, 3  ;;  %s757_s27 = scalar_lea.hbm %s892_s0, %s447_s23 }
  0x12   : > { %s146_s28 = scalar_lea.vmem [#allocation2], %s429_s24  ;;  %p761_p9 = pnand %p464_p8, %p732_p3 }
  0x13   : > { %s157_s29 = sshll.u32 %s146_s28, 4  ;;  %s143_s3 = scalar_lea.sflag [#allocation3], %s750_s22  ;;  %s765_s29 = int_to_ptr.vmem [resolvable:$true] %s157_s29 }
  0x14   : > { %s528_s4 = scalar_lea.hbm %s757_s27, 128  ;;  %p530_p13 = pneg %p761_p9 }
  0x15   : > { %p529_p12 = scmp.ne.s32.totalorder %s757_s27, %s528_s4  ;;  %s533_s7 = scalar_lea.hbm %s892_s0, 256 }
  0x16   : > { %p534_p2 = scmp.lt.u32.totalorder %s757_s27, %s892_s0  ;;  %p535_p3 = scmp.lt.u32.totalorder %s533_s7, %s528_s4 }
  0x17   : > { %p531_p0 = pnand %p530_p13, %p529_p12  ;;  %p537_p5 = scmp.lt.u32.totalorder %s528_s4, %s757_s27 }
  0x18   : > { %p536_p4 = por %p535_p3, %p534_p2 }
  0x19   : > { %p532_p1 = pneg %p531_p0 }
  0x1a   : > { %p538_p6 = por %p537_p5, %p536_p4 }
  0x1c   : > { %p539_p8 = pnand %p538_p6, %p532_p1 }
  0x1e   : > { %542 = shalt.err (!%p539_p8)
}
  0x1f   : > { %s543_s17 = scalar_lea.vmem %s765_s29, 128  ;;  %s674_s18 = smov [#allocation2]  }
  0x20   : > { %p544_p12 = scmp.ne.s32.totalorder %s765_s29, %s543_s17  ;;  %s548_s19 = sshll.u32 %s674_s18, 4  ;;  %s549_s19 = int_to_ptr.vmem [resolvable:$false] %s548_s19 }
  0x21   : > { %s550_s23 = scalar_lea.vmem %s549_s19, 256  ;;  %p551_p11 = scmp.lt.s32.totalorder %s765_s29, %s549_s19 }
  0x22   : > { %p546_p0 = pnand %p544_p12, %p530_p13  ;;  %p552_p2 = scmp.lt.s32.totalorder %s550_s23, %s543_s17 }
  0x24   : > { %p547_p10 = pneg %p546_p0  ;;  %p553_p3 = por %p552_p2, %p551_p11 }
  0x26   : > { %p554_p4 = pnand %p553_p3, %p547_p10 }
  0x28   : > { %557 = shalt.err (!%p554_p4)
}
  0x29   : > { %460 = dma.hbm_to_vmem [thread:$0]  (!%p761_p9), %s757_s27, 128, %s765_s29, %s143_s3  }
  0x2a   : > { %p899_p1 = scmp.lt.s32.totalorder %s672_s14, 3  ;;  %p900_p5 = scmp.ge.s32.totalorder %s672_s14, 1 }
  0x2b   : > { %s432_s25 = sshll.u32 %s750_s22, 1  ;;  %s433_s26 = sshll.u32 %s668_s13, 5 }
  0x2c   : > { %p799_p6 = pnand %p900_p5, %p899_p1  ;;  %s808_s5 = scalar_lea.hbm %s893_s1, %s433_s26 }
  0x2d   : > { %s168_s6 = scalar_lea.vmem [#allocation5], %s432_s25  ;;  %s165_s27 = scalar_lea.sflag [#allocation6], %s750_s22 }
  0x2e   : > { %s901_s24 = scalar_select %p799_p6, 1, 0 }
  0x2f   : > { %s177_s7 = sshll.u32 %s168_s6, 4  ;;  %s558_s29 = scalar_lea.hbm %s808_s5, 32  ;;  %s178_s7 = int_to_ptr.vmem [resolvable:$true] %s177_s7 }
  0x30   : > { %p559_p10 = scmp.ne.s32.totalorder %s808_s5, %s558_s29  ;;  %s563_s9 = scalar_lea.hbm %s893_s1, 64 }
  0x31   : > { %p564_p12 = scmp.lt.u32.totalorder %s808_s5, %s893_s1  ;;  %p565_p0 = scmp.lt.u32.totalorder %s563_s9, %s558_s29 }
  0x32   : > { %p561_p11 = pnand %p559_p10, %p530_p13  ;;  %p567_p3 = scmp.lt.u32.totalorder %s558_s29, %s808_s5 }
  0x33   : > { %p566_p2 = por %p565_p0, %p564_p12 }
  0x34   : > { %p562_p8 = pneg %p561_p11 }
  0x35   : > { %p568_p4 = por %p567_p3, %p566_p2 }
  0x37   : > { %p569_p1 = pnand %p568_p4, %p562_p8 }
  0x39   : > { %572 = shalt.err (!%p569_p1)
}
  0x3a   : > { %s573_s22 = scalar_lea.vmem %s178_s7, 32  ;;  %s675_s19 = smov [#allocation5]  }
  0x3b   : > { %p574_p5 = scmp.ne.s32.totalorder %s178_s7, %s573_s22  ;;  %s578_s23 = sshll.u32 %s675_s19, 4  ;;  %s579_s23 = int_to_ptr.vmem [resolvable:$false] %s578_s23 }
  0x3c   : > { %s580_s25 = scalar_lea.vmem %s579_s23, 64  ;;  %p581_p7 = scmp.lt.s32.totalorder %s178_s7, %s579_s23 }
  0x3d   : > { %p576_p10 = pnand %p574_p5, %p530_p13  ;;  %p582_p6 = scmp.lt.s32.totalorder %s580_s25, %s573_s22 }
  0x3f   : > { %p577_p11 = pneg %p576_p10  ;;  %p583_p0 = por %p582_p6, %p581_p7 }
  0x41   : > { %p584_p12 = pnand %p583_p0, %p577_p11 }
  0x43   : > { %587 = shalt.err (!%p584_p12)
}
  0x44   : > { %463 = dma.hbm_to_vmem [thread:$0]  (!%p761_p9), %s808_s5, 32, %s178_s7, %s165_s27  }
  0x45   : > { %p902_p8 = scmp.ne.s32.totalorder %s901_s24, 0 }
  0x46   : > { %s188_s26 = sand.u32 (!%p902_p8), 1, %s656_s10   ;;  %p903_p13 = scmp.ne.s32.totalorder (!%p902_p8), %s897_s20, 0 }
  0x47   : > { %186 = sbr.rel (%p902_p8) target bundleno = 175 (0xaf), region = 28  ;;  %s435_s28 = sshll.u32 (!%p902_p8), %s188_s26, 3 }
  0x48   : > { %s189_s4 = scalar_lea.sflag (!%p902_p8), [#allocation3], %s188_s26  ;;  %s192_s6 = scalar_lea.vmem (!%p902_p8), [#allocation2], %s435_s28 }
  0x4e   : > { %639 = dma.done.wait (%p903_p13), %s189_s4, 128  }
  0x4f   : > { %641 = vsyncadd (%p903_p13), %s189_s4, 4294967168  ;;  %s436_s29 = sshll.u32 %s188_s26, 1  ;;  %s198_s3 = scalar_lea.sflag [#allocation6], %s188_s26 }
  0x50   : > { %s201_s30 = scalar_lea.vmem [#allocation5], %s436_s29 }
  0x51   : > { %643 = dma.done.wait (%p903_p13), %s198_s3, 32  }
  0x52   : > { %645 = vsyncadd (%p903_p13), %s198_s3, 4294967264  ;;  %p225_p7 = scmp.eq.s32.totalorder %s664_s12, 0 }
  0x53   : > { %v676_v0 = vmov (%p225_p7), 0.0  }
  0x54   : > { %230 = sbr.rel (!%p225_p7) target bundleno = 91 (0x5b), region = 40  ;;  %231 = vst [vmem:[#allocation7] sm:$0xf] (%p225_p7), %v676_v0  ;;  %232 = vst [vmem:[#allocation7 + $0x4] sm:$0xf] (%p225_p7), %v676_v0 }
  0x55   : > { %233 = vst [vmem:[#allocation7 + $0x8] sm:$0xf] (%p225_p7), %v676_v0 }
  0x5b PF: > { %v234_v1 = vlaneseq  ;;  %v236_v2 = vld [vmem:[%s192_s6] sm:$0xf]  ;;  %v438_v3 = vld [vmem:[%s201_s30] ss:$0 sm:$0xff]  ;;  %vm238_vm0 = vcmask 1043456   ;;  %v677_v12 = vmov 0.0  }
  0x5c   : > { %v239_v4 = vsel %vm238_vm0, %v236_v2, -inf  ;;  %v440_v5 = vld [vmem:[%s192_s6 + $0x4] sm:$0xf]  ;;  %v441_v6 = vld [vmem:[%s201_s30 + $0x1] ss:$0 sm:$0xff]  ;;  %s678_s12 = smov [#allocation7]  }
  0x5d   : > { %v235_v7 = vshrl.u32 %v234_v1, 7  ;;  %v240_v8 = vrot.slane %v239_v4, 4  ;;  %v276_v9 = vsel %vm238_vm0, %v440_v5, -inf  ;;  %v314_v16 = vld [vmem:[#allocation7 + $0x4] sm:$0xf]  ;;  %s330_s20 = sshll.u32 %s678_s12, 4  ;;  %s331_s20 = int_to_ptr.vmem [resolvable:$true] %s330_s20 }
  0x5e   : > { %v277_v10 = vrot.slane %v276_v9, 4  ;;  %v310_v61 = vld [vmem:[#allocation7] sm:$0xf]  ;;  %v318_v62 = vld [vmem:[#allocation7 + $0x8] sm:$0xf]  ;;  %p848_p9 = scmp.eq.s32.totalorder %s426_s15, 1  ;;  %p595_p4 = scmp.lt.s32.totalorder %s331_s20, %s331_s20 }
  0x5f   : > { %v241_v11 = vmax.f32 %v239_v4, %v240_v8  ;;  %vm265_vm1 = vcmp.eq.s32.totalorder %v438_v3, %v235_v7  ;;  %vm302_vm2 = vcmp.eq.s32.totalorder %v441_v6, %v235_v7  ;;  %s588_s5 = scalar_lea.vmem %s331_s20, 192 }
  0x60   : > { %v439_v13 = vsel %vm265_vm1, 1.0, %v677_v12  ;;  %v278_v14 = vmax.f32 %v276_v9, %v277_v10  ;;  %v442_v15 = vsel %vm302_vm2, 1.0, %v677_v12  ;;  %p589_p6 = scmp.ne.s32.totalorder %s331_s20, %s588_s5  ;;  %p596_p1 = scmp.lt.s32.totalorder %s588_s5, %s588_s5 }
  0x61   : > { %v242_v17 = vrot.slane %v241_v11, 2  ;;  %v307_v18 = vadd.f32 %v442_v15, %v439_v13 }
  0x62   : > { %v279_v19 = vrot.slane %v278_v14, 2  ;;  %p590_p2 = pnand %p589_p6, %p848_p9  ;;  %p597_p5 = por %p596_p1, %p595_p4 }
  0x63   : > { %v243_v20 = vmax.f32 %v241_v11, %v242_v17  ;;  %v315_v21 = vadd.f32 %v314_v16, %v307_v18 }
  0x64   : > { %v280_v22 = vmax.f32 %v278_v14, %v279_v19  ;;  %p591_p3 = pneg %p590_p2 }
  0x65   : > { %v244_v23 = vrot.slane %v243_v20, 1  ;;  %316 = vst [vmem:[#allocation7 + $0x4] sm:$0xf] %v315_v21 }
  0x66   : > { %v281_v24 = vrot.slane %v280_v22, 1  ;;  %p598_p10 = pnand %p597_p5, %p591_p3 }
  0x67   : > { %v245_v25 = vmax.f32 %v243_v20, %v244_v23 }
  0x68   : > { %v282_v26 = vmax.f32 %v280_v22, %v281_v24 }
  0x69   : > { %v246_v27 = vsub.f32 %v236_v2, %v245_v25 }
  0x6a   : > { %v283_v28 = vsub.f32 %v440_v5, %v282_v26 }
  0x6b   : > { %v247_v29 = vmul.f32 1.442695, %v246_v27 }
  0x6c   : > { %v284_v30 = vmul.f32 1.442695, %v283_v28 }
  0x6d   : > { %520 = vpow2.f32 %v247_v29 }
  0x6e   : > { %522 = vpow2.f32 %v284_v30 }
  0x77   : > { %v521_v31 = vpop.eup %520 }
  0x78   : > { %v523_v32 = vpop.eup %522  ;;  %v249_v33 = vsel %vm238_vm0, %v521_v31, 0.0 }
  0x79   : > { %v250_v34 = vrot.slane %v249_v33, 4  ;;  %v286_v35 = vsel %vm238_vm0, %v523_v32, 0.0 }
  0x7a   : > { %v287_v36 = vrot.slane %v286_v35, 4 }
  0x7b   : > { %v251_v37 = vadd.f32 %v250_v34, %v249_v33 }
  0x7c   : > { %v288_v38 = vadd.f32 %v287_v36, %v286_v35 }
  0x7d   : > { %v252_v39 = vrot.slane %v251_v37, 2 }
  0x7e   : > { %v289_v40 = vrot.slane %v288_v38, 2 }
  0x7f   : > { %v253_v41 = vadd.f32 %v252_v39, %v251_v37 }
  0x80   : > { %v290_v42 = vadd.f32 %v289_v40, %v288_v38 }
  0x81   : > { %v254_v43 = vrot.slane %v253_v41, 1 }
  0x82   : > { %v291_v44 = vrot.slane %v290_v42, 1 }
  0x83   : > { %v255_v45 = vadd.f32 %v254_v43, %v253_v41 }
  0x84   : > { %v292_v46 = vadd.f32 %v291_v44, %v290_v42 }
  0x85   : > { %524 = vrcp.f32 %v255_v45 }
  0x86   : > { %526 = vrcp.f32 %v292_v46 }
  0x8f   : > { %v525_v47 = vpop.eup %524 }
  0x90   : > { %v527_v48 = vpop.eup %526  ;;  %v257_v49 = vmul.f32 %v525_v47, %v255_v45 }
  0x91   : > { %v294_v50 = vmul.f32 %v527_v48, %v292_v46 }
  0x92   : > { %v258_v51 = vsub.f32 2.0, %v257_v49 }
  0x93   : > { %v295_v52 = vsub.f32 2.0, %v294_v50 }
  0x94   : > { %v259_v53 = vmul.f32 %v525_v47, %v258_v51 }
  0x95   : > { %v296_v54 = vmul.f32 %v527_v48, %v295_v52 }
  0x96   : > { %v260_v55 = vmul.f32 %v521_v31, %v259_v53 }
  0x97   : > { %v297_v56 = vmul.f32 %v523_v32, %v296_v54 }
  0x98   : > { %v268_v57 = vmul.f32 %v439_v13, %v260_v55  ;;  %v271_v58 = vmul.f32 %v260_v55, %v260_v55 }
  0x99   : > { %v305_v59 = vmul.f32 %v442_v15, %v297_v56  ;;  %v308_v60 = vmul.f32 %v297_v56, %v297_v56 }
  0x9b   : > { %v306_v63 = vadd.f32 %v305_v59, %v268_v57  ;;  %v309_v0 = vadd.f32 %v308_v60, %v271_v58 }
  0x9d   : > { %v311_v1 = vadd.f32 %v310_v61, %v306_v63  ;;  %v319_v2 = vadd.f32 %v318_v62, %v309_v0 }
  0x9f   : > { %312 = vst [vmem:[#allocation7] sm:$0xf] %v311_v1  ;;  %320 = vst [vmem:[#allocation7 + $0x8] sm:$0xf] %v319_v2 }
  0xa0   : > { %601 = shalt.err (!%p598_p10)
}
  0xa1   : > { %s602_s27 = scalar_lea.hbm %s894_s2, 192 }
  0xa2   : > { %p603_p11 = scmp.ne.s32.totalorder %s894_s2, %s602_s27  ;;  %p608_p8 = scmp.lt.u32.totalorder %s602_s27, %s894_s2 }
  0xa4   : > { %p604_p0 = pnand %p603_p11, %p848_p9 }
  0xa6   : > { %p605_p12 = pneg %p604_p0 }
  0xa8   : > { %p610_p13 = pnand %p608_p8, %p605_p12 }
  0xaa   : > { %613 = shalt.err (!%p610_p13)
}
  0xab   : > { %s679_s22 = smov 64   ;;  %s680_s19 = smov 4  }
  0xac   : > { %454 = dma.vmem_to_hbm [thread:$0]  (%p848_p9), %s331_s20, 192, %s894_s2, [#allocation4], %s679_s22, %s679_s22, %s680_s19  }
  0xad   : > { %647 = dma.done.wait (%p848_p9), [#allocation4], 192  }
  0xae   : > { %649 = vsyncadd (%p848_p9), [#allocation4], 4294967104 }
  0xaf PF: > { %s19_s14 = sadd.s32 1, %s672_s14   ;;  %s905_s9 = smov %s656_s10 }
  0xb0   : > { %p16_p7 = scmp.ge.s32.totalorder %s19_s14, 4   ;;  %s906_s10 = smov %s660_s11 }
  0xb1   : > { %s907_s11 = smov %s747_s21  ;;  %s908_s12 = smov %s668_s13 }
  0xb2   : > { %s909_s13 = smov %s911_s16  ;;  %18 = sbr.rel (!%p16_p7) target bundleno = 7 (0x7), region = 86 }
  0xb9   :  { %346 = vsyncpa [#allocation3], 1 }
  0xba   :  { %348 = vsyncpa [#allocation3 + $0x1], 1 }
  0xbb   :  { %349 = vsyncpa [#allocation6], 1 }
  0xbc   :  { %351 = vsyncpa [#allocation6 + $0x1], 1 }
  0xbd   :  { %352 = vsyncpa [#allocation4], 1 }
  0xbe   :  { %354 = vsyncpa [#allocation4 + $0x1], 1 }

</bundles_post_ra>
